<compile_context>
chip_gen: v7x
topology: tpu7x:2x2x1
jax: 0.10.0
libtpu: 0.0.40
codegen_flags: <defaults>
</compile_context>

<pallas_src>
import jax
import jax.numpy as jnp
from jax import lax
from jax.experimental import pallas as pl
from jax.experimental.pallas import tpu as pltpu


def _retanh(x):
    # nonlinearity='retanh':  max(tanh(x), 0)
    return jnp.maximum(jnp.tanh(x), 0.0)


def _round_up(n, m):
    return ((n + m - 1) // m) * m


def _make_ctrnn_kernel(one_minus_dtau, t_blk, unroll, mxu_dtype):
    def kernel(pre_ref,       # VMEM (T_blk, B_blk, H_p): dtau*(x@Wahx.T + bah)
               bh_ref,        # VMEM (T_blk, B_blk, H_p): bhneverlearn
               wahh_t_ref,    # VMEM (H_p, H_p): dtau * Wahh.T (resident)
               ah0_ref,       # VMEM (1, H_p): initial ah (resident)
               h_out_ref,     # VMEM out (T_blk, B_blk, H_p)
               ah_scr,        # VMEM scratch (B_blk, H_p): persists across grid
               h_scr):        # VMEM scratch (B_blk, H_p): persists across grid
        # (Re)initialize the recurrent state at the first time block of each
        # batch block (time is the inner, "arbitrary" grid axis).
        @pl.when(pl.program_id(1) == 0)
        def _init():
            bb, hp = ah_scr.shape
            ah0 = jnp.broadcast_to(ah0_ref[...], (bb, hp))
            ah_scr[...] = ah0
            h_scr[...] = _retanh(ah0)

        def step(t, carry):
            ah, h = carry
            # dtau is pre-folded into the weight and into pre[t].
            rec = jnp.dot(h.astype(mxu_dtype), wahh_t_ref[...],
                          preferred_element_type=jnp.float32)
            ah_new = one_minus_dtau * ah + (rec + pre_ref[t])
            h_new = _retanh(ah_new) + bh_ref[t]
            h_out_ref[t] = h_new
            return ah_new, h_new

        # Carry ah/h in vregs across the block; touch scratch only at the
        # block boundaries (needed to persist state across grid steps).
        ah_fin, h_fin = lax.fori_loop(0, t_blk, step,
                                      (ah_scr[...], h_scr[...]),
                                      unroll=unroll)
        ah_scr[...] = ah_fin
        h_scr[...] = h_fin

    return kernel


def ctrnn_forward(x, dt, tau, bhneverlearn, wahx, wahh, wyh, bah, by, ah0,
                  t_block=32, b_block=None, matmul_dtype=None):
    """Matches CTRNN.forward(input, dt, Tau, bhneverlearn), nonlinearity='retanh'.

    x            : (numtrials, numT, dim_input)
    bhneverlearn : (numtrials, numT, dim_recurrent)
    matmul_dtype : None/f32 (exact) or jnp.bfloat16 (fast MXU path, v6e/v7x).
    returns (y, hstore, None) with y: (numtrials, numT, dim_output),
                                 hstore: (numtrials, numT, dim_recurrent)
    """
    B, T, Din = x.shape
    H = wahh.shape[0]
    dtau = float(dt) / float(tau)
    one_minus_dtau = 1.0 - dtau
    f32 = jnp.float32
    mxu_dtype = f32 if matmul_dtype is None else matmul_dtype

    x = x.astype(f32)
    bh = bhneverlearn.astype(f32)
    wahx = wahx.astype(f32)
    wahh = wahh.astype(f32)
    wyh = wyh.astype(f32)
    bah = bah.reshape(-1).astype(f32)
    by = by.reshape(-1).astype(f32)
    ah0 = ah0.reshape(-1).astype(f32)

    # Hoisted input projection, produced directly in (T, B, H) layout so no
    # extra HBM transpose pass is needed for the kernel's streaming input.
    pre_tm = dtau * (jnp.einsum("btd,hd->tbh", x, wahx,
                                precision=lax.Precision.HIGHEST) + bah)
    bh_tm = jnp.transpose(bh, (1, 0, 2))                        # (T, B, H)

    # TPU-friendly padding: B -> mult of 8 (sublanes), H -> mult of 128
    # (lanes).  All padding is zeros, so padded lanes never feed real lanes
    # through the zero-padded Wahh.T and retanh(0)=0 keeps them inert.
    B_p = _round_up(B, 8)
    if b_block is None:
        B_blk = B_p                       # single batch block (safe everywhere)
    else:
        B_blk = _round_up(max(8, int(b_block)), 8)
        B_p = _round_up(B_p, B_blk)
    H_p = _round_up(H, 128)

    # Time-block sizing against a conservative scoped-VMEM budget (fits
    # v5e/v6e defaults and v7x's 64 MiB physical VMEM).
    T_blk = max(1, min(int(t_block), T))
    w_bytes = 2 if mxu_dtype == jnp.bfloat16 else 4

    def _vmem_needed(tb):
        stream = 3 * 2 * tb * B_blk * H_p * 4          # pre/bh/out, dbl-buffered
        resident = 2 * H_p * H_p * w_bytes + 2 * H_p * 4 + 2 * B_blk * H_p * 4
        return stream + resident

    budget = 40 * 2 ** 20
    while _vmem_needed(T_blk) > budget and T_blk > 8:
        T_blk = max(8, T_blk // 2)
    T_p = _round_up(T, T_blk)
    vmem_limit = int(min(max(2 * _vmem_needed(T_blk), 16 * 2 ** 20),
                         48 * 2 ** 20))
    unroll = T_blk if T_blk <= 16 else 8               # partial unroll for big blocks

    pre_tm = jnp.pad(pre_tm, ((0, T_p - T), (0, B_p - B), (0, H_p - H)))
    bh_tm = jnp.pad(bh_tm, ((0, T_p - T), (0, B_p - B), (0, H_p - H)))
    # Fold dt/tau into the recurrent weight (paid once in XLA, not T times).
    wahh_t = jnp.pad(dtau * wahh.T, ((0, H_p - H), (0, H_p - H))).astype(mxu_dtype)
    ah0_p = jnp.pad(ah0, (0, H_p - H)).reshape(1, H_p)

    kernel = _make_ctrnn_kernel(one_minus_dtau, T_blk, unroll, mxu_dtype)

    h_tm = pl.pallas_call(
        kernel,
        out_shape=jax.ShapeDtypeStruct((T_p, B_p, H_p), f32),
        grid=(B_p // B_blk, T_p // T_blk),
        in_specs=[
            pl.BlockSpec((T_blk, B_blk, H_p), lambda b, t: (t, b, 0)),   # pre
            pl.BlockSpec((T_blk, B_blk, H_p), lambda b, t: (t, b, 0)),   # bh
            pl.BlockSpec((H_p, H_p), lambda b, t: (0, 0)),               # dtau*Wahh.T
            pl.BlockSpec((1, H_p), lambda b, t: (0, 0)),                 # ah0
        ],
        out_specs=pl.BlockSpec((T_blk, B_blk, H_p), lambda b, t: (t, b, 0)),
        scratch_shapes=[
            pltpu.VMEM((B_blk, H_p), f32),   # ah (carried across time blocks)
            pltpu.VMEM((B_blk, H_p), f32),   # h  (carried across time blocks)
        ],
        compiler_params=pltpu.CompilerParams(
            dimension_semantics=("parallel", "arbitrary"),
            vmem_limit_bytes=vmem_limit,
        ),
    )(pre_tm, bh_tm, wahh_t, ah0_p)

    h_valid = h_tm[:T, :B, :H]                                   # (T, B, H)
    # Readout directly from the kernel's (T,B,H) output (no extra transpose on
    # the y path); hstore transpose only because the API returns (B,T,H).
    y = jnp.einsum("tbh,oh->bto", h_valid, wyh,
                   precision=lax.Precision.HIGHEST) + by         # (B, T, Dout)
    hstore = jnp.transpose(h_valid, (1, 0, 2))                   # (B, T, H)
    return y, hstore, None


def ctrnn_ref(x, dt, tau, bhneverlearn, wahx, wahh, wyh, bah, by, ah0):
    """Pure-JAX reference mirroring the PyTorch forward exactly (f32, highest)."""
    B, T, Din = x.shape
    H = wahh.shape[0]
    hp = lax.Precision.HIGHEST
    ah = jnp.broadcast_to(ah0, (B, H))
    h = jnp.maximum(jnp.tanh(ah), 0.0)
    hs = []
    for t in range(T):
        rec = jnp.dot(h, wahh.T, precision=hp)
        inp = jnp.dot(x[:, t], wahx.T, precision=hp)
        ah = ah + dt / tau * (-ah + rec + inp + bah)
        h = jnp.maximum(jnp.tanh(ah), 0.0) + bhneverlearn[:, t, :]
        hs.append(h)
    hstore = jnp.stack(hs, axis=1)
    y = jnp.einsum("bth,oh->bto", hstore, wyh, precision=hp) + by
    return y, hstore


if __name__ == "__main__":
    # Small shapes implied by the module: dim_input, dim_recurrent, dim_output.
    numtrials, numT = 2, 20
    dim_input, dim_recurrent, dim_output = 4, 32, 2
    dt, Tau = 1.0, 10.0

    key = jax.random.PRNGKey(0)
    ks = jax.random.split(key, 8)
    wahx = jax.random.normal(ks[0], (dim_recurrent, dim_input), jnp.float32) * 0.3
    wahh = jax.random.normal(ks[1], (dim_recurrent, dim_recurrent), jnp.float32) * 0.1
    wyh = jax.random.normal(ks[2], (dim_output, dim_recurrent), jnp.float32) * 0.3
    bah = jax.random.normal(ks[3], (dim_recurrent,), jnp.float32) * 0.1
    by = jax.random.normal(ks[4], (dim_output,), jnp.float32) * 0.1
    ah0 = jnp.zeros((dim_recurrent,), jnp.float32)      # default ah0 = zeros

    x = jax.random.normal(ks[5], (numtrials, numT, dim_input), jnp.float32)
    bhneverlearn = 0.01 * jax.random.normal(
        ks[6], (numtrials, numT, dim_recurrent), jnp.float32)

    y_ref, h_ref = ctrnn_ref(x, dt, Tau, bhneverlearn,
                             wahx, wahh, wyh, bah, by, ah0)

    # Exact f32 path; small t_block exercises multi-time-block scratch carry
    # (T=20 -> 3 time blocks, padded T=24).
    y, hstore, _ = ctrnn_forward(x, dt, Tau, bhneverlearn,
                                 wahx, wahh, wyh, bah, by, ah0, t_block=8)
    jax.block_until_ready((y, hstore))
    assert y.shape == (numtrials, numT, dim_output)
    assert hstore.shape == (numtrials, numT, dim_recurrent)
    assert jnp.allclose(hstore, h_ref, atol=5e-4, rtol=5e-4), "hstore mismatch"
    assert jnp.allclose(y, y_ref, atol=5e-4, rtol=5e-4), "y mismatch"

    # Fast MXU path: bf16 matmul operands, f32 elementwise state (v6e/v7x).
    y16, h16, _ = ctrnn_forward(x, dt, Tau, bhneverlearn,
                                wahx, wahh, wyh, bah, by, ah0,
                                t_block=32, matmul_dtype=jnp.bfloat16)
    jax.block_until_ready((y16, h16))
    assert jnp.allclose(h16, h_ref, atol=5e-2, rtol=5e-2), "bf16 hstore mismatch"
    assert jnp.allclose(y16, y_ref, atol=5e-2, rtol=5e-2), "bf16 y mismatch"

    print("KERNEL_OK")
</pallas_src>

<mosaic_0001>
module attributes {stable_mosaic.version = 11 : i64} {
  func.func @kernel(%arg0: i32, %arg1: i32, %arg2: memref<8x8x128xf32, #tpu.memory_space<vmem>>, %arg3: memref<8x8x128xf32, #tpu.memory_space<vmem>>, %arg4: memref<128x128xf32, #tpu.memory_space<vmem>>, %arg5: memref<1x128xf32, #tpu.memory_space<vmem>>, %arg6: memref<8x8x128xf32, #tpu.memory_space<vmem>>, %arg7: memref<8x128xf32, #tpu.memory_space<vmem>>, %arg8: memref<8x128xf32, #tpu.memory_space<vmem>>) attributes {dimension_semantics = [#tpu.dimension_semantics<parallel>, #tpu.dimension_semantics<arbitrary>], iteration_bounds = array<i64: 1, 3>, scalar_prefetch = 0 : i64, scratch_operands = 2 : i64, tpu.core_type = #tpu.core_type<tc>, window_params = [{transform_indices = @transform_0, window_bounds = array<i64: 8, 8, 128>}, {transform_indices = @transform_1, window_bounds = array<i64: 8, 8, 128>}, {pipeline_mode = #tpu.pipeline_mode<synchronous>, transform_indices = @transform_2, window_bounds = array<i64: 128, 128>}, {pipeline_mode = #tpu.pipeline_mode<synchronous>, transform_indices = @transform_3, window_bounds = array<i64: 1, 128>}, {transform_indices = @transform_4, window_bounds = array<i64: 8, 8, 128>}]} {
    %c0_i32 = arith.constant 0 : i32
    %0 = arith.cmpi eq, %arg1, %c0_i32 : i32
    %1 = arith.extui %0 : i1 to i32
    %c0_i32_0 = arith.constant 0 : i32
    %2 = arith.cmpi ne, %1, %c0_i32_0 : i32
    scf.if %2 {
      %c0_96 = arith.constant 0 : index
      %c0_97 = arith.constant 0 : index
      %167 = vector.load %arg5[%c0_96, %c0_97] : memref<1x128xf32, #tpu.memory_space<vmem>>, vector<1x128xf32>
      %168 = vector.shape_cast %167 : vector<1x128xf32> to vector<1x128xf32>
      %169 = vector.broadcast %168 : vector<1x128xf32> to vector<8x128xf32>
      %c0_98 = arith.constant 0 : index
      %c0_99 = arith.constant 0 : index
      %170 = vector.load %arg7[%c0_98, %c0_99] : memref<8x128xf32, #tpu.memory_space<vmem>>, vector<8x128xf32>
      tpu.vector_store %arg7[%c0_98, %c0_99], %169 {strides = array<i32>} : memref<8x128xf32, #tpu.memory_space<vmem>>, vector<8x128xf32>,
      %171 = math.tanh %169 : vector<8x128xf32>
      %cst_100 = arith.constant 0.000000e+00 : f32
      %172 = vector.broadcast %cst_100 : f32 to vector<8x128xf32>
      %173 = arith.maximumf %171, %172 : vector<8x128xf32>
      %c0_101 = arith.constant 0 : index
      %c0_102 = arith.constant 0 : index
      %174 = vector.load %arg8[%c0_101, %c0_102] : memref<8x128xf32, #tpu.memory_space<vmem>>, vector<8x128xf32>
      tpu.vector_store %arg8[%c0_101, %c0_102], %173 {strides = array<i32>} : memref<8x128xf32, #tpu.memory_space<vmem>>, vector<8x128xf32>,
    } else {
    }
    %c0 = arith.constant 0 : index
    %c0_1 = arith.constant 0 : index
    %3 = vector.load %arg7[%c0, %c0_1] : memref<8x128xf32, #tpu.memory_space<vmem>>, vector<8x128xf32>
    %c0_2 = arith.constant 0 : index
    %c0_3 = arith.constant 0 : index
    %4 = vector.load %arg8[%c0_2, %c0_3] : memref<8x128xf32, #tpu.memory_space<vmem>>, vector<8x128xf32>
    %c0_i32_4 = arith.constant 0 : i32
    %c0_5 = arith.constant 0 : index
    %c0_6 = arith.constant 0 : index
    %5 = vector.load %arg4[%c0_5, %c0_6] : memref<128x128xf32, #tpu.memory_space<vmem>>, vector<128x128xf32>
    %cst = arith.constant dense<0.000000e+00> : vector<8x128xf32>
    %6 = tpu.matmul %4, %5, %cst {dimension_numbers = #tpu.dot_dimension_numbers<[1], [0], [0], [1], [0, 0, 1, 1], [], []>} : vector<8x128xf32>, vector<128x128xf32>, vector<8x128xf32> -> vector<8x128xf32>
    %cst_7 = arith.constant 0.899999976 : f32
    %7 = vector.broadcast %cst_7 : f32 to vector<8x128xf32>
    %8 = arith.mulf %7, %3 : vector<8x128xf32>
    %9 = arith.index_cast %c0_i32_4 : i32 to index
    %c0_8 = arith.constant 0 : index
    %c0_9 = arith.constant 0 : index
    %10 = vector.load %arg2[%9, %c0_8, %c0_9] : memref<8x8x128xf32, #tpu.memory_space<vmem>>, vector<1x8x128xf32>
    %11 = vector.shape_cast %10 : vector<1x8x128xf32> to vector<8x128xf32>
    %12 = arith.addf %6, %11 : vector<8x128xf32>
    %13 = arith.addf %8, %12 : vector<8x128xf32>
    %14 = math.tanh %13 : vector<8x128xf32>
    %cst_10 = arith.constant 0.000000e+00 : f32
    %15 = vector.broadcast %cst_10 : f32 to vector<8x128xf32>
    %16 = arith.maximumf %14, %15 : vector<8x128xf32>
    %17 = arith.index_cast %c0_i32_4 : i32 to index
    %c0_11 = arith.constant 0 : index
    %c0_12 = arith.constant 0 : index
    %18 = vector.load %arg3[%17, %c0_11, %c0_12] : memref<8x8x128xf32, #tpu.memory_space<vmem>>, vector<1x8x128xf32>
    %19 = vector.shape_cast %18 : vector<1x8x128xf32> to vector<8x128xf32>
    %20 = arith.addf %16, %19 : vector<8x128xf32>
    %21 = arith.index_cast %c0_i32_4 : i32 to index
    %c0_13 = arith.constant 0 : index
    %c0_14 = arith.constant 0 : index
    %22 = vector.load %arg6[%21, %c0_13, %c0_14] : memref<8x8x128xf32, #tpu.memory_space<vmem>>, vector<1x8x128xf32>
    %23 = vector.shape_cast %22 : vector<1x8x128xf32> to vector<8x128xf32>
    %24 = vector.shape_cast %20 : vector<8x128xf32> to vector<1x8x128xf32>
    tpu.vector_store %arg6[%21, %c0_13, %c0_14], %24 {strides = array<i32>} : memref<8x8x128xf32, #tpu.memory_space<vmem>>, vector<1x8x128xf32>,
    %c1_i32 = arith.constant 1 : i32
    %c0_15 = arith.constant 0 : index
    %c0_16 = arith.constant 0 : index
    %25 = vector.load %arg4[%c0_15, %c0_16] : memref<128x128xf32, #tpu.memory_space<vmem>>, vector<128x128xf32>
    %cst_17 = arith.constant dense<0.000000e+00> : vector<8x128xf32>
    %26 = tpu.matmul %20, %25, %cst_17 {dimension_numbers = #tpu.dot_dimension_numbers<[1], [0], [0], [1], [0, 0, 1, 1], [], []>} : vector<8x128xf32>, vector<128x128xf32>, vector<8x128xf32> -> vector<8x128xf32>
    %cst_18 = arith.constant 0.899999976 : f32
    %27 = vector.broadcast %cst_18 : f32 to vector<8x128xf32>
    %28 = arith.mulf %27, %13 : vector<8x128xf32>
    %29 = arith.index_cast %c1_i32 : i32 to index
    %c0_19 = arith.constant 0 : index
    %c0_20 = arith.constant 0 : index
    %30 = vector.load %arg2[%29, %c0_19, %c0_20] : memref<8x8x128xf32, #tpu.memory_space<vmem>>, vector<1x8x128xf32>
    %31 = vector.shape_cast %30 : vector<1x8x128xf32> to vector<8x128xf32>
    %32 = arith.addf %26, %31 : vector<8x128xf32>
    %33 = arith.addf %28, %32 : vector<8x128xf32>
    %34 = math.tanh %33 : vector<8x128xf32>
    %cst_21 = arith.constant 0.000000e+00 : f32
    %35 = vector.broadcast %cst_21 : f32 to vector<8x128xf32>
    %36 = arith.maximumf %34, %35 : vector<8x128xf32>
    %37 = arith.index_cast %c1_i32 : i32 to index
    %c0_22 = arith.constant 0 : index
    %c0_23 = arith.constant 0 : index
    %38 = vector.load %arg3[%37, %c0_22, %c0_23] : memref<8x8x128xf32, #tpu.memory_space<vmem>>, vector<1x8x128xf32>
    %39 = vector.shape_cast %38 : vector<1x8x128xf32> to vector<8x128xf32>
    %40 = arith.addf %36, %39 : vector<8x128xf32>
    %41 = arith.index_cast %c1_i32 : i32 to index
    %c0_24 = arith.constant 0 : index
    %c0_25 = arith.constant 0 : index
    %42 = vector.load %arg6[%41, %c0_24, %c0_25] : memref<8x8x128xf32, #tpu.memory_space<vmem>>, vector<1x8x128xf32>
    %43 = vector.shape_cast %42 : vector<1x8x128xf32> to vector<8x128xf32>
    %44 = vector.shape_cast %40 : vector<8x128xf32> to vector<1x8x128xf32>
    tpu.vector_store %arg6[%41, %c0_24, %c0_25], %44 {strides = array<i32>} : memref<8x8x128xf32, #tpu.memory_space<vmem>>, vector<1x8x128xf32>,
    %c2_i32 = arith.constant 2 : i32
    %c0_26 = arith.constant 0 : index
    %c0_27 = arith.constant 0 : index
    %45 = vector.load %arg4[%c0_26, %c0_27] : memref<128x128xf32, #tpu.memory_space<vmem>>, vector<128x128xf32>
    %cst_28 = arith.constant dense<0.000000e+00> : vector<8x128xf32>
    %46 = tpu.matmul %40, %45, %cst_28 {dimension_numbers = #tpu.dot_dimension_numbers<[1], [0], [0], [1], [0, 0, 1, 1], [], []>} : vector<8x128xf32>, vector<128x128xf32>, vector<8x128xf32> -> vector<8x128xf32>
    %cst_29 = arith.constant 0.899999976 : f32
    %47 = vector.broadcast %cst_29 : f32 to vector<8x128xf32>
    %48 = arith.mulf %47, %33 : vector<8x128xf32>
    %49 = arith.index_cast %c2_i32 : i32 to index
    %c0_30 = arith.constant 0 : index
    %c0_31 = arith.constant 0 : index
    %50 = vector.load %arg2[%49, %c0_30, %c0_31] : memref<8x8x128xf32, #tpu.memory_space<vmem>>, vector<1x8x128xf32>
    %51 = vector.shape_cast %50 : vector<1x8x128xf32> to vector<8x128xf32>
    %52 = arith.addf %46, %51 : vector<8x128xf32>
    %53 = arith.addf %48, %52 : vector<8x128xf32>
    %54 = math.tanh %53 : vector<8x128xf32>
    %cst_32 = arith.constant 0.000000e+00 : f32
    %55 = vector.broadcast %cst_32 : f32 to vector<8x128xf32>
    %56 = arith.maximumf %54, %55 : vector<8x128xf32>
    %57 = arith.index_cast %c2_i32 : i32 to index
    %c0_33 = arith.constant 0 : index
    %c0_34 = arith.constant 0 : index
    %58 = vector.load %arg3[%57, %c0_33, %c0_34] : memref<8x8x128xf32, #tpu.memory_space<vmem>>, vector<1x8x128xf32>
    %59 = vector.shape_cast %58 : vector<1x8x128xf32> to vector<8x128xf32>
    %60 = arith.addf %56, %59 : vector<8x128xf32>
    %61 = arith.index_cast %c2_i32 : i32 to index
    %c0_35 = arith.constant 0 : index
    %c0_36 = arith.constant 0 : index
    %62 = vector.load %arg6[%61, %c0_35, %c0_36] : memref<8x8x128xf32, #tpu.memory_space<vmem>>, vector<1x8x128xf32>
    %63 = vector.shape_cast %62 : vector<1x8x128xf32> to vector<8x128xf32>
    %64 = vector.shape_cast %60 : vector<8x128xf32> to vector<1x8x128xf32>
    tpu.vector_store %arg6[%61, %c0_35, %c0_36], %64 {strides = array<i32>} : memref<8x8x128xf32, #tpu.memory_space<vmem>>, vector<1x8x128xf32>,
    %c3_i32 = arith.constant 3 : i32
    %c0_37 = arith.constant 0 : index
    %c0_38 = arith.constant 0 : index
    %65 = vector.load %arg4[%c0_37, %c0_38] : memref<128x128xf32, #tpu.memory_space<vmem>>, vector<128x128xf32>
    %cst_39 = arith.constant dense<0.000000e+00> : vector<8x128xf32>
    %66 = tpu.matmul %60, %65, %cst_39 {dimension_numbers = #tpu.dot_dimension_numbers<[1], [0], [0], [1], [0, 0, 1, 1], [], []>} : vector<8x128xf32>, vector<128x128xf32>, vector<8x128xf32> -> vector<8x128xf32>
    %cst_40 = arith.constant 0.899999976 : f32
    %67 = vector.broadcast %cst_40 : f32 to vector<8x128xf32>
    %68 = arith.mulf %67, %53 : vector<8x128xf32>
    %69 = arith.index_cast %c3_i32 : i32 to index
    %c0_41 = arith.constant 0 : index
    %c0_42 = arith.constant 0 : index
    %70 = vector.load %arg2[%69, %c0_41, %c0_42] : memref<8x8x128xf32, #tpu.memory_space<vmem>>, vector<1x8x128xf32>
    %71 = vector.shape_cast %70 : vector<1x8x128xf32> to vector<8x128xf32>
    %72 = arith.addf %66, %71 : vector<8x128xf32>
    %73 = arith.addf %68, %72 : vector<8x128xf32>
    %74 = math.tanh %73 : vector<8x128xf32>
    %cst_43 = arith.constant 0.000000e+00 : f32
    %75 = vector.broadcast %cst_43 : f32 to vector<8x128xf32>
    %76 = arith.maximumf %74, %75 : vector<8x128xf32>
    %77 = arith.index_cast %c3_i32 : i32 to index
    %c0_44 = arith.constant 0 : index
    %c0_45 = arith.constant 0 : index
    %78 = vector.load %arg3[%77, %c0_44, %c0_45] : memref<8x8x128xf32, #tpu.memory_space<vmem>>, vector<1x8x128xf32>
    %79 = vector.shape_cast %78 : vector<1x8x128xf32> to vector<8x128xf32>
    %80 = arith.addf %76, %79 : vector<8x128xf32>
    %81 = arith.index_cast %c3_i32 : i32 to index
    %c0_46 = arith.constant 0 : index
    %c0_47 = arith.constant 0 : index
    %82 = vector.load %arg6[%81, %c0_46, %c0_47] : memref<8x8x128xf32, #tpu.memory_space<vmem>>, vector<1x8x128xf32>
    %83 = vector.shape_cast %82 : vector<1x8x128xf32> to vector<8x128xf32>
    %84 = vector.shape_cast %80 : vector<8x128xf32> to vector<1x8x128xf32>
    tpu.vector_store %arg6[%81, %c0_46, %c0_47], %84 {strides = array<i32>} : memref<8x8x128xf32, #tpu.memory_space<vmem>>, vector<1x8x128xf32>,
    %c4_i32 = arith.constant 4 : i32
    %c0_48 = arith.constant 0 : index
    %c0_49 = arith.constant 0 : index
    %85 = vector.load %arg4[%c0_48, %c0_49] : memref<128x128xf32, #tpu.memory_space<vmem>>, vector<128x128xf32>
    %cst_50 = arith.constant dense<0.000000e+00> : vector<8x128xf32>
    %86 = tpu.matmul %80, %85, %cst_50 {dimension_numbers = #tpu.dot_dimension_numbers<[1], [0], [0], [1], [0, 0, 1, 1], [], []>} : vector<8x128xf32>, vector<128x128xf32>, vector<8x128xf32> -> vector<8x128xf32>
    %cst_51 = arith.constant 0.899999976 : f32
    %87 = vector.broadcast %cst_51 : f32 to vector<8x128xf32>
    %88 = arith.mulf %87, %73 : vector<8x128xf32>
    %89 = arith.index_cast %c4_i32 : i32 to index
    %c0_52 = arith.constant 0 : index
    %c0_53 = arith.constant 0 : index
    %90 = vector.load %arg2[%89, %c0_52, %c0_53] : memref<8x8x128xf32, #tpu.memory_space<vmem>>, vector<1x8x128xf32>
    %91 = vector.shape_cast %90 : vector<1x8x128xf32> to vector<8x128xf32>
    %92 = arith.addf %86, %91 : vector<8x128xf32>
    %93 = arith.addf %88, %92 : vector<8x128xf32>
    %94 = math.tanh %93 : vector<8x128xf32>
    %cst_54 = arith.constant 0.000000e+00 : f32
    %95 = vector.broadcast %cst_54 : f32 to vector<8x128xf32>
    %96 = arith.maximumf %94, %95 : vector<8x128xf32>
    %97 = arith.index_cast %c4_i32 : i32 to index
    %c0_55 = arith.constant 0 : index
    %c0_56 = arith.constant 0 : index
    %98 = vector.load %arg3[%97, %c0_55, %c0_56] : memref<8x8x128xf32, #tpu.memory_space<vmem>>, vector<1x8x128xf32>
    %99 = vector.shape_cast %98 : vector<1x8x128xf32> to vector<8x128xf32>
    %100 = arith.addf %96, %99 : vector<8x128xf32>
    %101 = arith.index_cast %c4_i32 : i32 to index
    %c0_57 = arith.constant 0 : index
    %c0_58 = arith.constant 0 : index
    %102 = vector.load %arg6[%101, %c0_57, %c0_58] : memref<8x8x128xf32, #tpu.memory_space<vmem>>, vector<1x8x128xf32>
    %103 = vector.shape_cast %102 : vector<1x8x128xf32> to vector<8x128xf32>
    %104 = vector.shape_cast %100 : vector<8x128xf32> to vector<1x8x128xf32>
    tpu.vector_store %arg6[%101, %c0_57, %c0_58], %104 {strides = array<i32>} : memref<8x8x128xf32, #tpu.memory_space<vmem>>, vector<1x8x128xf32>,
    %c5_i32 = arith.constant 5 : i32
    %c0_59 = arith.constant 0 : index
    %c0_60 = arith.constant 0 : index
    %105 = vector.load %arg4[%c0_59, %c0_60] : memref<128x128xf32, #tpu.memory_space<vmem>>, vector<128x128xf32>
    %cst_61 = arith.constant dense<0.000000e+00> : vector<8x128xf32>
    %106 = tpu.matmul %100, %105, %cst_61 {dimension_numbers = #tpu.dot_dimension_numbers<[1], [0], [0], [1], [0, 0, 1, 1], [], []>} : vector<8x128xf32>, vector<128x128xf32>, vector<8x128xf32> -> vector<8x128xf32>
    %cst_62 = arith.constant 0.899999976 : f32
    %107 = vector.broadcast %cst_62 : f32 to vector<8x128xf32>
    %108 = arith.mulf %107, %93 : vector<8x128xf32>
    %109 = arith.index_cast %c5_i32 : i32 to index
    %c0_63 = arith.constant 0 : index
    %c0_64 = arith.constant 0 : index
    %110 = vector.load %arg2[%109, %c0_63, %c0_64] : memref<8x8x128xf32, #tpu.memory_space<vmem>>, vector<1x8x128xf32>
    %111 = vector.shape_cast %110 : vector<1x8x128xf32> to vector<8x128xf32>
    %112 = arith.addf %106, %111 : vector<8x128xf32>
    %113 = arith.addf %108, %112 : vector<8x128xf32>
    %114 = math.tanh %113 : vector<8x128xf32>
    %cst_65 = arith.constant 0.000000e+00 : f32
    %115 = vector.broadcast %cst_65 : f32 to vector<8x128xf32>
    %116 = arith.maximumf %114, %115 : vector<8x128xf32>
    %117 = arith.index_cast %c5_i32 : i32 to index
    %c0_66 = arith.constant 0 : index
    %c0_67 = arith.constant 0 : index
    %118 = vector.load %arg3[%117, %c0_66, %c0_67] : memref<8x8x128xf32, #tpu.memory_space<vmem>>, vector<1x8x128xf32>
    %119 = vector.shape_cast %118 : vector<1x8x128xf32> to vector<8x128xf32>
    %120 = arith.addf %116, %119 : vector<8x128xf32>
    %121 = arith.index_cast %c5_i32 : i32 to index
    %c0_68 = arith.constant 0 : index
    %c0_69 = arith.constant 0 : index
    %122 = vector.load %arg6[%121, %c0_68, %c0_69] : memref<8x8x128xf32, #tpu.memory_space<vmem>>, vector<1x8x128xf32>
    %123 = vector.shape_cast %122 : vector<1x8x128xf32> to vector<8x128xf32>
    %124 = vector.shape_cast %120 : vector<8x128xf32> to vector<1x8x128xf32>
    tpu.vector_store %arg6[%121, %c0_68, %c0_69], %124 {strides = array<i32>} : memref<8x8x128xf32, #tpu.memory_space<vmem>>, vector<1x8x128xf32>,
    %c6_i32 = arith.constant 6 : i32
    %c0_70 = arith.constant 0 : index
    %c0_71 = arith.constant 0 : index
    %125 = vector.load %arg4[%c0_70, %c0_71] : memref<128x128xf32, #tpu.memory_space<vmem>>, vector<128x128xf32>
    %cst_72 = arith.constant dense<0.000000e+00> : vector<8x128xf32>
    %126 = tpu.matmul %120, %125, %cst_72 {dimension_numbers = #tpu.dot_dimension_numbers<[1], [0], [0], [1], [0, 0, 1, 1], [], []>} : vector<8x128xf32>, vector<128x128xf32>, vector<8x128xf32> -> vector<8x128xf32>
    %cst_73 = arith.constant 0.899999976 : f32
    %127 = vector.broadcast %cst_73 : f32 to vector<8x128xf32>
    %128 = arith.mulf %127, %113 : vector<8x128xf32>
    %129 = arith.index_cast %c6_i32 : i32 to index
    %c0_74 = arith.constant 0 : index
    %c0_75 = arith.constant 0 : index
    %130 = vector.load %arg2[%129, %c0_74, %c0_75] : memref<8x8x128xf32, #tpu.memory_space<vmem>>, vector<1x8x128xf32>
    %131 = vector.shape_cast %130 : vector<1x8x128xf32> to vector<8x128xf32>
    %132 = arith.addf %126, %131 : vector<8x128xf32>
    %133 = arith.addf %128, %132 : vector<8x128xf32>
    %134 = math.tanh %133 : vector<8x128xf32>
    %cst_76 = arith.constant 0.000000e+00 : f32
    %135 = vector.broadcast %cst_76 : f32 to vector<8x128xf32>
    %136 = arith.maximumf %134, %135 : vector<8x128xf32>
    %137 = arith.index_cast %c6_i32 : i32 to index
    %c0_77 = arith.constant 0 : index
    %c0_78 = arith.constant 0 : index
    %138 = vector.load %arg3[%137, %c0_77, %c0_78] : memref<8x8x128xf32, #tpu.memory_space<vmem>>, vector<1x8x128xf32>
    %139 = vector.shape_cast %138 : vector<1x8x128xf32> to vector<8x128xf32>
    %140 = arith.addf %136, %139 : vector<8x128xf32>
    %141 = arith.index_cast %c6_i32 : i32 to index
    %c0_79 = arith.constant 0 : index
    %c0_80 = arith.constant 0 : index
    %142 = vector.load %arg6[%141, %c0_79, %c0_80] : memref<8x8x128xf32, #tpu.memory_space<vmem>>, vector<1x8x128xf32>
    %143 = vector.shape_cast %142 : vector<1x8x128xf32> to vector<8x128xf32>
    %144 = vector.shape_cast %140 : vector<8x128xf32> to vector<1x8x128xf32>
    tpu.vector_store %arg6[%141, %c0_79, %c0_80], %144 {strides = array<i32>} : memref<8x8x128xf32, #tpu.memory_space<vmem>>, vector<1x8x128xf32>,
    %c7_i32 = arith.constant 7 : i32
    %c0_81 = arith.constant 0 : index
    %c0_82 = arith.constant 0 : index
    %145 = vector.load %arg4[%c0_81, %c0_82] : memref<128x128xf32, #tpu.memory_space<vmem>>, vector<128x128xf32>
    %cst_83 = arith.constant dense<0.000000e+00> : vector<8x128xf32>
    %146 = tpu.matmul %140, %145, %cst_83 {dimension_numbers = #tpu.dot_dimension_numbers<[1], [0], [0], [1], [0, 0, 1, 1], [], []>} : vector<8x128xf32>, vector<128x128xf32>, vector<8x128xf32> -> vector<8x128xf32>
    %cst_84 = arith.constant 0.899999976 : f32
    %147 = vector.broadcast %cst_84 : f32 to vector<8x128xf32>
    %148 = arith.mulf %147, %133 : vector<8x128xf32>
    %149 = arith.index_cast %c7_i32 : i32 to index
    %c0_85 = arith.constant 0 : index
    %c0_86 = arith.constant 0 : index
    %150 = vector.load %arg2[%149, %c0_85, %c0_86] : memref<8x8x128xf32, #tpu.memory_space<vmem>>, vector<1x8x128xf32>
    %151 = vector.shape_cast %150 : vector<1x8x128xf32> to vector<8x128xf32>
    %152 = arith.addf %146, %151 : vector<8x128xf32>
    %153 = arith.addf %148, %152 : vector<8x128xf32>
    %154 = math.tanh %153 : vector<8x128xf32>
    %cst_87 = arith.constant 0.000000e+00 : f32
    %155 = vector.broadcast %cst_87 : f32 to vector<8x128xf32>
    %156 = arith.maximumf %154, %155 : vector<8x128xf32>
    %157 = arith.index_cast %c7_i32 : i32 to index
    %c0_88 = arith.constant 0 : index
    %c0_89 = arith.constant 0 : index
    %158 = vector.load %arg3[%157, %c0_88, %c0_89] : memref<8x8x128xf32, #tpu.memory_space<vmem>>, vector<1x8x128xf32>
    %159 = vector.shape_cast %158 : vector<1x8x128xf32> to vector<8x128xf32>
    %160 = arith.addf %156, %159 : vector<8x128xf32>
    %161 = arith.index_cast %c7_i32 : i32 to index
    %c0_90 = arith.constant 0 : index
    %c0_91 = arith.constant 0 : index
    %162 = vector.load %arg6[%161, %c0_90, %c0_91] : memref<8x8x128xf32, #tpu.memory_space<vmem>>, vector<1x8x128xf32>
    %163 = vector.shape_cast %162 : vector<1x8x128xf32> to vector<8x128xf32>
    %164 = vector.shape_cast %160 : vector<8x128xf32> to vector<1x8x128xf32>
    tpu.vector_store %arg6[%161, %c0_90, %c0_91], %164 {strides = array<i32>} : memref<8x8x128xf32, #tpu.memory_space<vmem>>, vector<1x8x128xf32>,
    %c8_i32 = arith.constant 8 : i32
    %c0_92 = arith.constant 0 : index
    %c0_93 = arith.constant 0 : index
    %165 = vector.load %arg7[%c0_92, %c0_93] : memref<8x128xf32, #tpu.memory_space<vmem>>, vector<8x128xf32>
    tpu.vector_store %arg7[%c0_92, %c0_93], %153 {strides = array<i32>} : memref<8x128xf32, #tpu.memory_space<vmem>>, vector<8x128xf32>,
    %c0_94 = arith.constant 0 : index
    %c0_95 = arith.constant 0 : index
    %166 = vector.load %arg8[%c0_94, %c0_95] : memref<8x128xf32, #tpu.memory_space<vmem>>, vector<8x128xf32>
    tpu.vector_store %arg8[%c0_94, %c0_95], %160 {strides = array<i32>} : memref<8x128xf32, #tpu.memory_space<vmem>>, vector<8x128xf32>,
    return
  }
  func.func @transform_0(%arg0: i32, %arg1: i32) -> (i32, i32, i32) {
    %c0_i32 = arith.constant 0 : i32
    %c0_i32_0 = arith.constant 0 : i32
    return %arg1, %arg0, %c0_i32 : i32, i32, i32
  }
  func.func @transform_1(%arg0: i32, %arg1: i32) -> (i32, i32, i32) {
    %c0_i32 = arith.constant 0 : i32
    %c0_i32_0 = arith.constant 0 : i32
    return %arg1, %arg0, %c0_i32 : i32, i32, i32
  }
  func.func @transform_2(%arg0: i32, %arg1: i32) -> (i32, i32) {
    %c0_i32 = arith.constant 0 : i32
    %c0_i32_0 = arith.constant 0 : i32
    %c0_i32_1 = arith.constant 0 : i32
    return %c0_i32, %c0_i32_0 : i32, i32
  }
  func.func @transform_3(%arg0: i32, %arg1: i32) -> (i32, i32) {
    %c0_i32 = arith.constant 0 : i32
    %c0_i32_0 = arith.constant 0 : i32
    %c0_i32_1 = arith.constant 0 : i32
    return %c0_i32, %c0_i32_0 : i32, i32
  }
  func.func @transform_4(%arg0: i32, %arg1: i32) -> (i32, i32, i32) {
    %c0_i32 = arith.constant 0 : i32
    %c0_i32_0 = arith.constant 0 : i32
    return %arg1, %arg0, %c0_i32 : i32, i32, i32
  }
}

</mosaic_0001>

<bundles_post_ra>
// kernel: tpu_custom_call.1
= control target key start
LH: loop header
LB: loop body
LE: loop exit
PB: predicated region body
PF: predicated region fallthrough
CT: control target
= control target key end

     0   :  { %s2652_s0 = inlined_call_operand.hbm [shape: f32[24,8,128], index: 0, kind: input, shape index: {}]   ;;  %s2653_s1 = inlined_call_operand.hbm [shape: f32[24,8,128], index: 1, kind: input, shape index: {}]   ;;  %s2654_s2 = inlined_call_operand.hbm [shape: f32[128,128], index: 2, kind: input, shape index: {}]   ;;  %s2655_s3 = inlined_call_operand.vmem [shape: f32[1,128], index: 3, kind: input, shape index: {}]   ;;  %s2656_s4 = inlined_call_operand.hbm [shape: f32[24,8,128], index: 4, kind: output, shape index: {}]  }
   0x1   :  { %2665 = sst [smem:[#allocation16_spill]] %s2652_s0 }
   0x2   :  { %2666 = sst [smem:[#allocation17_spill]] %s2654_s2 }
   0x3   :  { %9 = vsyncpa [#allocation5], 0 }
   0x4   :  { %11 = vsyncpa [#allocation5 + $0x1], 0 }
   0x5   :  { %12 = vsyncpa [#allocation8], 0 }
   0x6   :  { %14 = vsyncpa [#allocation8 + $0x1], 0 }
   0x7   :  { %15 = vsyncpa [#allocation6], 0 }
   0x8   :  { %17 = vsyncpa [#allocation6 + $0x1], 0  ;;  %s2193_s15 = smov 0   ;;  %s2195_s16 = smov 0  }
   0x9   :  { %s2197_s17 = smov 0   ;;  %s2199_s18 = smov 0  }
   0xa   :  { %s2201_s19 = smov 0   ;;  %s2203_s20 = smov 0  }
   0xb LB: > { %s2224_s21 = sadd.s32 4294967295, %s2155_s20   ;;  %s1220_s22 = sadd.s32 4294967294, %s2155_s20   ;;  %s2155_s20 = sphi %s2203_s20, %s23_s20   ;;  %s2151_s19 = sphi %s2201_s19, %s2690_s19   ;;  %s2147_s18 = sphi %s2199_s18, %s2689_s18   ;;  %s2143_s17 = sphi %s2197_s17, %s2688_s17   ;;  %s2139_s16 = sphi %s2195_s16, %s2687_s16   ;;  %s2135_s15 = sphi %s2193_s15, %s2686_s15  }
   0xc   : > { %p57_p0 = scmp.ne.s32.totalorder %s2139_s16, %s2135_s15  ;;  %p2657_p1 = scmp.eq.s32.totalorder %s2224_s21, 0 }
   0xd   : > { %p159_p3 = scmp.eq.s32.totalorder %s1220_s22, 2  ;;  %p1221_p5 = scmp.ge.s32.totalorder %s2155_s20, 1 }
   0xe   : > { %p2233_p4 = por %p2657_p1, %p57_p0  ;;  %p166_p7 = scmp.lt.s32.totalorder %s2155_s20, 4 }
   0xf   : > { %p2238_p6 = por %p159_p3, %p57_p0  ;;  %s2157_s26 = smov [#allocation9]  }
  0x10   : > { %s2667_s23 = scalar_select %p2233_p4, 1, 0 }
  0x11   : > { %s2668_s24 = scalar_select %p2238_p6, 1, 0 }
  0x12   : > { %p2243_p8 = pnand %p1221_p5, %p166_p7  ;;  %s178_s27 = sshll.u32 %s2157_s26, 4  ;;  %s179_s27 = int_to_ptr.vmem [resolvable:$true] %s178_s27 }
  0x13   : > { %s32_s29 = sadd.s32 1, %s2151_s19  ;;  %s2671_s2 = sld [smem:[#allocation17_spill]] }
  0x14   : > { %s2669_s25 = scalar_select %p2243_p8, 1, 0 }
  0x15   : > { %p1884_p9 = pneg %p2243_p8 }
  0x17   : > { %p2251_p10 = pnand %p1884_p9, %p2657_p1 }
  0x19   : > { %s1977_s6 = scalar_lea.hbm %s2671_s2, 2048  ;;  %p1979_p12 = pneg %p2251_p10 }
  0x1a   : > { %p1978_p11 = scmp.ne.s32.totalorder %s2671_s2, %s1977_s6  ;;  %p1984_p3 = scmp.lt.u32.totalorder %s1977_s6, %s2671_s2 }
  0x1c   : > { %p1980_p13 = pnand %p1979_p12, %p1978_p11 }
  0x1e   : > { %p1981_p0 = pneg %p1980_p13 }
  0x20   : > { %p1986_p5 = pnand %p1984_p3, %p1981_p0 }
  0x22   : > { %1989 = shalt.err (!%p1986_p5)
}
  0x23   : > { %s1990_s11 = scalar_lea.vmem %s179_s27, 2048  ;;  %p1998_p2 = scmp.lt.s32.totalorder %s179_s27, %s179_s27 }
  0x24   : > { %p1991_p7 = scmp.ne.s32.totalorder %s179_s27, %s1990_s11  ;;  %p1999_p6 = scmp.lt.s32.totalorder %s1990_s11, %s1990_s11 }
  0x26   : > { %p1993_p9 = pnand %p1991_p7, %p1979_p12  ;;  %p2000_p4 = por %p1999_p6, %p1998_p2 }
  0x28   : > { %p1994_p1 = pneg %p1993_p9 }
  0x2a   : > { %p2001_p8 = pnand %p2000_p4, %p1994_p1 }
  0x2c   : > { %2004 = shalt.err (!%p2001_p8)
}
  0x2d   : > { %s2660_s12 = smov 128   ;;  %s2662_s13 = smov 8  }
  0x2e   : > { %1887 = dma.hbm_to_vmem [thread:$0]  (!%p2251_p10), %s2671_s2, 2048, %s179_s27, [#allocation8], %s2660_s12, %s2660_s12, %s2662_s13  }
  0x2f   : > { %p33_p1 = scmp.ge.s32.totalorder %s32_s29, 3  ;;  %s44_s26 = sadd.s32 1, %s2143_s17 }
  0x30   : > { %p51_p2 = scmp.ne.s32.totalorder %s2143_s17, %s2139_s16  ;;  %p52_p4 = scmp.eq.s32.totalorder %s2155_s20, 0 }
  0x31   : > { %s2692_s29 = smov (%p33_p1, %s32_s29), 0  ;;  %p2674_p8 = scmp.eq.s32.totalorder %s2224_s21, 2 }
  0x32   : > { %2672 = sst [smem:[#allocation15_spill]] %s2692_s29  ;;  %p2281_p6 = por %p52_p4, %p51_p2 }
  0x33   : > { %p2287_p11 = por %p2674_p8, %p51_p2  ;;  %s39_s5 = ssub.s32 %s2151_s19, %s2692_s29 }
  0x34   : > { %p1900_p12 = scmp.lt.s32.totalorder %s2155_s20, 3  ;;  %p42_p10 = scmp.eq.s32.totalorder %s39_s5, 0 }
  0x35   : > { %s195_s27 = sand.u32 1, %s2143_s17   ;;  %s1263_s8 = sshll.u32 %s2151_s19, 10 }
  0x36   : > { %s1224_s6 = sshll.u32 %s195_s27, 6  ;;  %s2676_s0 = sld [smem:[#allocation16_spill]] }
  0x37   : > { %s2296_s7 = scalar_select %p42_p10, %s2143_s17, %s44_s26  }
  0x38   : > { %s199_s14 = scalar_lea.vmem [#allocation4], %s1224_s6  ;;  %p2308_p13 = pnand %p1900_p12, %p2281_p6 }
  0x39   : > { %s207_s22 = sshll.u32 %s199_s14, 4  ;;  %s2315_s9 = scalar_lea.hbm %s2653_s1, %s1263_s8  ;;  %s2304_s22 = int_to_ptr.vmem [resolvable:$true] %s207_s22 }
  0x3a   : > { %s221_s10 = scalar_lea.vmem [#allocation7], %s1224_s6  ;;  %s2319_s2 = scalar_lea.sflag [#allocation5], %s195_s27 }
  0x3b   : > { %s2317_s13 = sshll.u32 %s221_s10, 4  ;;  %p2007_p3 = pneg %p2308_p13  ;;  %s2351_s13 = int_to_ptr.vmem [resolvable:$true] %s2317_s13 }
  0x3c   : > { %s2302_s11 = scalar_lea.hbm %s2676_s0, %s1263_s8  ;;  %s2010_s12 = scalar_lea.hbm %s2676_s0, 3072 }
  0x3d   : > { %s2005_s14 = scalar_lea.hbm %s2302_s11, 1024  ;;  %p2011_p9 = scmp.lt.u32.totalorder %s2302_s11, %s2676_s0 }
  0x3e   : > { %p2006_p0 = scmp.ne.s32.totalorder %s2302_s11, %s2005_s14  ;;  %p2012_p1 = scmp.lt.u32.totalorder %s2010_s12, %s2005_s14 }
  0x3f   : > { %p2014_p4 = scmp.lt.u32.totalorder %s2005_s14, %s2302_s11 }
  0x40   : > { %p2008_p5 = pnand %p2007_p3, %p2006_p0  ;;  %p2013_p2 = por %p2012_p1, %p2011_p9 }
  0x42   : > { %p2009_p7 = pneg %p2008_p5  ;;  %p2015_p6 = por %p2014_p4, %p2013_p2 }
  0x44   : > { %p2016_p8 = pnand %p2015_p6, %p2009_p7 }
  0x46   : > { %2019 = shalt.err (!%p2016_p8)
}
  0x47   : > { %s2020_s27 = scalar_lea.vmem %s2304_s22, 1024  ;;  %s2160_s29 = smov [#allocation4]  }
  0x48   : > { %p2021_p12 = scmp.ne.s32.totalorder %s2304_s22, %s2020_s27  ;;  %s2025_s6 = sshll.u32 %s2160_s29, 4  ;;  %s2026_s6 = int_to_ptr.vmem [resolvable:$false] %s2025_s6 }
  0x49   : > { %s2027_s10 = scalar_lea.vmem %s2026_s6, 2048  ;;  %p2028_p5 = scmp.lt.s32.totalorder %s2304_s22, %s2026_s6 }
  0x4a   : > { %p2023_p10 = pnand %p2021_p12, %p2007_p3  ;;  %p2029_p9 = scmp.lt.s32.totalorder %s2027_s10, %s2020_s27 }
  0x4c   : > { %p2024_p0 = pneg %p2023_p10  ;;  %p2030_p1 = por %p2029_p9, %p2028_p5 }
  0x4e   : > { %p2031_p2 = pnand %p2030_p1, %p2024_p0 }
  0x50   : > { %2034 = shalt.err (!%p2031_p2)
}
  0x51   : > { %s2678_s14 = smov 8   ;;  %s2679_s30 = smov 128  }
  0x52   : > { %1891 = dma.hbm_to_vmem [thread:$0]  (!%p2308_p13), %s2302_s11, 1024, %s2304_s22, %s2319_s2, %s2679_s30, %s2679_s30, %s2678_s14  }
  0x53   : > { %s217_s12 = sand.u32 1, %s2155_s20   ;;  %s2035_s8 = scalar_lea.hbm %s2315_s9, 1024 }
  0x54   : > { %s2354_s26 = scalar_lea.sflag [#allocation8], %s217_s12  ;;  %p2036_p7 = scmp.ne.s32.totalorder %s2315_s9, %s2035_s8 }
  0x55   : > { %s2040_s6 = scalar_lea.hbm %s2653_s1, 3072  ;;  %p2041_p8 = scmp.lt.u32.totalorder %s2315_s9, %s2653_s1 }
  0x56   : > { %p2038_p4 = pnand %p2036_p7, %p2007_p3  ;;  %p2042_p12 = scmp.lt.u32.totalorder %s2040_s6, %s2035_s8 }
  0x57   : > { %p2044_p0 = scmp.lt.u32.totalorder %s2035_s8, %s2315_s9 }
  0x58   : > { %p2039_p6 = pneg %p2038_p4  ;;  %p2043_p10 = por %p2042_p12, %p2041_p8 }
  0x5a   : > { %p2045_p5 = por %p2044_p0, %p2043_p10 }
  0x5c   : > { %p2046_p9 = pnand %p2045_p5, %p2039_p6 }
  0x5e   : > { %2049 = shalt.err (!%p2046_p9)
}
  0x5f   : > { %s2050_s2 = scalar_lea.vmem %s2351_s13, 1024  ;;  %s2161_s11 = smov [#allocation7]  }
  0x60   : > { %p2051_p1 = scmp.ne.s32.totalorder %s2351_s13, %s2050_s2  ;;  %s2055_s22 = sshll.u32 %s2161_s11, 4  ;;  %s2056_s22 = int_to_ptr.vmem [resolvable:$false] %s2055_s22 }
  0x61   : > { %s2057_s0 = scalar_lea.vmem %s2056_s22, 2048  ;;  %p2058_p4 = scmp.lt.s32.totalorder %s2351_s13, %s2056_s22 }
  0x62   : > { %p2053_p2 = pnand %p2051_p1, %p2007_p3  ;;  %p2059_p8 = scmp.lt.s32.totalorder %s2057_s0, %s2050_s2 }
  0x64   : > { %p2054_p7 = pneg %p2053_p2  ;;  %p2060_p12 = por %p2059_p8, %p2058_p4 }
  0x66   : > { %p2061_p10 = pnand %p2060_p12, %p2054_p7 }
  0x68   : > { %2064 = shalt.err (!%p2061_p10)
}
  0x69   : > { %1894 = dma.hbm_to_vmem [thread:$0]  (!%p2308_p13), %s2315_s9, 1024, %s2351_s13, %s2354_s26, %s2679_s30, %s2679_s30, %s2678_s14  }
  0x6a   : > { %p2680_p3 = scmp.ne.s32.totalorder %s2669_s25, 0 }
  0x6b   : > { %s2386_s12 = sand.u32 (!%p2680_p3), 1, %s2139_s16   ;;  %p2681_p6 = scmp.ne.s32.totalorder (!%p2680_p3), %s2667_s23, 0 }
  0x6c   : > { %241 = sbr.rel (%p2680_p3) target bundleno = 2035 (0x7f3), region = 36  ;;  %s1231_s8 = sshll.u32 (!%p2680_p3), %s2386_s12, 6 }
  0x6d   : > { %s244_s27 = scalar_lea.sflag (!%p2680_p3), [#allocation5], %s2386_s12  ;;  %s2390_s29 = scalar_lea.vmem (!%p2680_p3), [#allocation4], %s1231_s8 }
  0x73   : > { %2118 = dma.done.wait (%p2681_p6), %s244_s27, 1024  }
  0x74   : > { %2120 = vsyncadd (%p2681_p6), %s244_s27, 4294966272  ;;  %s252_s13 = sand.u32 1, %s2224_s21   ;;  %s2397_s5 = scalar_lea.vmem [#allocation7], %s1231_s8 }
  0x75   : > { %s253_s25 = scalar_lea.sflag [#allocation8], %s252_s13 }
  0x76   : > { %2122 = dma.done.wait (%p2681_p6), %s253_s25, 1024  }
  0x77   : > { %2124 = vsyncadd (%p2681_p6), %s253_s25, 4294966272  ;;  %p2682_p13 = scmp.eq.s32.totalorder %s2224_s21, 0 }
  0x79   : > { %2126 = dma.done.wait (%p2682_p13), [#allocation8], 2048   ;;  %p2683_p0 = pmov %p2682_p13 }
  0x7a   : > { %s2407_s9 = scalar_lea.vmem [#allocation10], %s1231_s8  ;;  %p1235_p5 = scmp.ne.s32.totalorder %s2147_s18, 0 }
  0x7b   : > { %2128 = vsyncadd (%p2683_p0), [#allocation8], 4294965248  ;;  %v1236_v0 = vld [vmem:[%s2655_s3] ss:$0 sm:$0xff] (!%p1235_p5) }
  0x7c   : > { %296 = sbr.rel (%p1235_p5) target bundleno = 138 (0x8a), region = 52  ;;  %304 = vst [vmem:[#allocation2] sm:$0xff] (!%p1235_p5), %v1236_v0  ;;  %1959 = vtanh.f32 (!%p1235_p5), %v1236_v0 }
  0x86   : > { %v1960_v1 = vpop.eup %1959 }
  0x87   : > { %v306_v2 = vmax.f32 %v1960_v1, 0.0 }
  0x89   : > { %307 = vst [vmem:[#allocation3] sm:$0xff] %v306_v2 }
  0x8a PF: > { %v310_v3 = vld [vmem:[#allocation9] sm:$0xff]  ;;  %v311_v4 = vld [vmem:[#allocation9 + $0x8] sm:$0xff]  ;;  %v312_v5 = vld [vmem:[#allocation9 + $0x10] sm:$0xff]  ;;  %v2162_v6 = vmov 0.0|0.0   ;;  %vm2163_vm0 = vmmov 0   ;;  %v2164_v9 = vmov 0.0  }
  0x8b   : > { %1682 = vmatprep.subr.bf16.mxu0 %v2162_v6  ;;  %v2414_v7 = vpack.c.bf16 %v311_v4, %v310_v3  ;;  %v313_v8 = vld [vmem:[#allocation9 + $0x18] sm:$0xff]  ;;  %1434 = vmatprep.mubr.msk.f32.mxu0 %vm2163_vm0, %v2164_v9  ;;  %v314_v11 = vld [vmem:[#allocation9 + $0x20] sm:$0xff]  ;;  %v315_v12 = vld [vmem:[#allocation9 + $0x28] sm:$0xff]  ;;  %s1265_s21 = sshll.u32 %s2147_s18, 10  ;;  %s1100_s23 = sshll.u32 %s2407_s9, 4  ;;  %s2603_s23 = int_to_ptr.vmem [resolvable:$true] %s1100_s23 }
  0x8c   : > { %1706 = vmatprep.subr.bf16.mxu1 %v2162_v6  ;;  %1469 = vmatprep.mubr.msk.f32.mxu1 %vm2163_vm0, %v2164_v9  ;;  %v2422_v10 = vpack.c.bf16 %v313_v8, %v312_v5  ;;  %v2428_v13 = vpack.c.bf16 %v315_v12, %v314_v11  ;;  %v316_v14 = vld [vmem:[#allocation9 + $0x30] sm:$0xff]  ;;  %v317_v15 = vld [vmem:[#allocation9 + $0x38] sm:$0xff]  ;;  %v318_v17 = vld [vmem:[#allocation9 + $0x40] sm:$0xff]  ;;  %s2601_s10 = scalar_lea.hbm %s2656_s4, %s1265_s21  ;;  %s1086_s2 = scalar_lea.sflag [#allocation6], %s2386_s12 }
  0x8d   : > { %1684 = vmatpush3.bf16.msra.mxu0 %v2414_v7  ;;  %1708 = vmatpush3.bf16.msra.mxu1 %v2414_v7  ;;  %v2434_v16 = vpack.c.bf16 %v317_v15, %v316_v14  ;;  %v319_v18 = vld [vmem:[#allocation9 + $0x48] sm:$0xff]  ;;  %v320_v20 = vld [vmem:[#allocation9 + $0x50] sm:$0xff]  ;;  %v321_v21 = vld [vmem:[#allocation9 + $0x58] sm:$0xff]  ;;  %s2065_s11 = scalar_lea.vmem %s2603_s23, 1024  ;;  %s2165_s18 = smov [#allocation10]  }
  0x8e   : > { %1685 = vmatprep.subr.bf16.mxu0 %v2162_v6  ;;  %1709 = vmatprep.subr.bf16.mxu1 %v2162_v6  ;;  %v2440_v19 = vpack.c.bf16 %v319_v18, %v318_v17  ;;  %v2446_v22 = vpack.c.bf16 %v321_v21, %v320_v20  ;;  %v322_v23 = vld [vmem:[#allocation9 + $0x60] sm:$0xff]  ;;  %v323_v24 = vld [vmem:[#allocation9 + $0x68] sm:$0xff]  ;;  %v324_v26 = vld [vmem:[#allocation9 + $0x70] sm:$0xff]  ;;  %p2066_p9 = scmp.ne.s32.totalorder %s2603_s23, %s2065_s11  ;;  %s2069_s22 = sshll.u32 %s2165_s18, 4  ;;  %s2070_s22 = int_to_ptr.vmem [resolvable:$false] %s2069_s22 }
  0x8f   : > { %v2452_v25 = vpack.c.bf16 %v323_v24, %v322_v23  ;;  %v325_v27 = vld [vmem:[#allocation9 + $0x78] sm:$0xff]  ;;  %v308_v30 = vld [vmem:[#allocation2] sm:$0xff]  ;;  %v327_v31 = vld [vmem:[%s2390_s29] sm:$0xff]  ;;  %s2071_s0 = scalar_lea.vmem %s2070_s22, 2048  ;;  %p2072_p7 = scmp.lt.s32.totalorder %s2603_s23, %s2070_s22 }
  0x90   : > { %v2458_v28 = vpack.c.bf16 %v325_v27, %v324_v26  ;;  %v309_v29 = vld [vmem:[#allocation3] sm:$0xff]  ;;  %v326_v32 = vmul.f32 0.9, %v308_v30  ;;  %v401_v38 = vld [vmem:[%s2397_s5] sm:$0xff]  ;;  %v1237_v41 = vld [vmem:[%s2390_s29 + $0x8] sm:$0xff]  ;;  %p2067_p1 = pnand %p2066_p9, %p2287_p11  ;;  %p2073_p4 = scmp.lt.s32.totalorder %s2071_s0, %s2065_s11 }
  0x91   : > { %1687 = vmatpush3.bf16.msra.mxu0 %v2422_v10  ;;  %1711 = vmatpush3.bf16.msra.mxu1 %v2422_v10  ;;  %v1238_v48 = vld [vmem:[%s2397_s5 + $0x8] sm:$0xff]  ;;  %v1240_v51 = vld [vmem:[%s2390_s29 + $0x10] sm:$0xff]  ;;  %v1243_v61 = vld [vmem:[%s2390_s29 + $0x18] sm:$0xff] }
  0x92   : > { %1688 = vmatprep.subr.bf16.mxu0 %v2162_v6  ;;  %1712 = vmatprep.subr.bf16.mxu1 %v2162_v6  ;;  %v1241_v58 = vld [vmem:[%s2397_s5 + $0x10] sm:$0xff]  ;;  %v1244_v4 = vld [vmem:[%s2397_s5 + $0x18] sm:$0xff]  ;;  %v1246_v11 = vld [vmem:[%s2390_s29 + $0x20] sm:$0xff]  ;;  %p2068_p2 = pneg %p2067_p1  ;;  %p2074_p8 = por %p2073_p4, %p2072_p7 }
  0x93   : > { %v1247_v21 = vld [vmem:[%s2397_s5 + $0x20] sm:$0xff] }
  0x94   : > { %p2075_p12 = pnand %p2074_p8, %p2068_p2 }
  0x95   : > { %1690 = vmatpush3.bf16.msra.mxu0 %v2428_v13  ;;  %1714 = vmatpush3.bf16.msra.mxu1 %v2428_v13 }
  0x96   : > { %1691 = vmatprep.subr.bf16.mxu0 %v2162_v6  ;;  %1715 = vmatprep.subr.bf16.mxu1 %v2162_v6 }
  0x99   : > { %1693 = vmatpush3.bf16.msra.mxu0 %v2434_v16  ;;  %1717 = vmatpush3.bf16.msra.mxu1 %v2434_v16 }
  0x9a   : > { %1694 = vmatprep.subr.bf16.mxu0 %v2162_v6  ;;  %1718 = vmatprep.subr.bf16.mxu1 %v2162_v6 }
  0x9d   : > { %1696 = vmatpush3.bf16.msra.mxu0 %v2440_v19  ;;  %1720 = vmatpush3.bf16.msra.mxu1 %v2440_v19 }
  0x9e   : > { %1697 = vmatprep.subr.bf16.mxu0 %v2162_v6  ;;  %1721 = vmatprep.subr.bf16.mxu1 %v2162_v6 }
  0xa1   : > { %1699 = vmatpush3.bf16.msra.mxu0 %v2446_v22  ;;  %1723 = vmatpush3.bf16.msra.mxu1 %v2446_v22 }
  0xa2   : > { %1700 = vmatprep.subr.bf16.mxu0 %v2162_v6  ;;  %1724 = vmatprep.subr.bf16.mxu1 %v2162_v6 }
  0xa5   : > { %1702 = vmatpush3.bf16.msra.mxu0 %v2452_v25  ;;  %1726 = vmatpush3.bf16.msra.mxu1 %v2452_v25 }
  0xa6   : > { %1703 = vmatprep.subr.bf16.mxu0 %v2162_v6  ;;  %1727 = vmatprep.subr.bf16.mxu1 %v2162_v6 }
  0xa9   : > { %1705 = vmatpush3.bf16.msra.mxu0 %v2458_v28  ;;  %1729 = vmatpush3.bf16.msra.mxu1 %v2458_v28 }
  0xaa   : > { %1730 = vmatprep.subr.bf16.mxu0 %v2162_v6  ;;  %1754 = vmatprep.subr.bf16.mxu1 %v2162_v6 }
  0xac   : > { %1435 = vmatmul.mubr.f32.vlgmr.msra.gmra.mrb[0].mxu0 %v309_v29 }
  0xad   : > { %1732 = vmatpush3.bf16.msra.mxu0 %v2414_v7  ;;  %1504 = vmatprep.mubr.msk.f32.mxu0 %vm2163_vm0, %v2164_v9 }
  0xae   : > { %1733 = vmatprep.subr.bf16.mxu0 %v2162_v6 }
  0xb1   : > { %1735 = vmatpush3.bf16.msra.mxu0 %v2422_v10 }
  0xb2   : > { %1736 = vmatprep.subr.bf16.mxu0 %v2162_v6 }
  0xb5   : > { %1738 = vmatpush3.bf16.msra.mxu0 %v2428_v13 }
  0xb6   : > { %1739 = vmatprep.subr.bf16.mxu0 %v2162_v6 }
  0xb9   : > { %1741 = vmatpush3.bf16.msra.mxu0 %v2434_v16 }
  0xba   : > { %1742 = vmatprep.subr.bf16.mxu0 %v2162_v6 }
  0xbd   : > { %1744 = vmatpush3.bf16.msra.mxu0 %v2440_v19 }
  0xbe   : > { %1745 = vmatprep.subr.bf16.mxu0 %v2162_v6 }
  0xc1   : > { %1747 = vmatpush3.bf16.msra.mxu0 %v2446_v22 }
  0xc2   : > { %1748 = vmatprep.subr.bf16.mxu0 %v2162_v6 }
  0xc5   : > { %1750 = vmatpush3.bf16.msra.mxu0 %v2452_v25 }
  0xc6   : > { %1751 = vmatprep.subr.bf16.mxu0 %v2162_v6 }
  0xc9   : > { %1753 = vmatpush3.bf16.msra.mxu0 %v2458_v28 }
  0xca   : > { %1778 = vmatprep.subr.bf16.mxu0 %v2162_v6 }
 0x17f   : > { %v394_v33 = vpop.f32.mrb[0].mxu0 }
 0x180   : > { %v395_v34 = vadd.f32 %v394_v33, %v327_v31  ;;  %v1436_v35 = vpop.f32.mrb[1].mxu0 }
 0x182   : > { %v398_v36 = vadd.f32 %v395_v34, %v326_v32  ;;  %v1253_v34 = vld [vmem:[%s2397_s5 + $0x30] sm:$0xff] }
 0x184   : > { %1961 = vtanh.f32 %v398_v36  ;;  %v420_v43 = vmul.f32 0.9, %v398_v36 }
 0x18e   : > { %v1962_v37 = vpop.eup %1961 }
 0x18f   : > { %v400_v39 = vmax.f32 %v1962_v37, 0.0  ;;  %v1255_v37 = vld [vmem:[%s2390_s29 + $0x38] sm:$0xff] }
 0x191   : > { %v402_v40 = vadd.f32 %v401_v38, %v400_v39 }
 0x193   : > { %403 = vst [vmem:[%s2407_s9] sm:$0xff] %v402_v40  ;;  %1470 = vmatmul.mubr.f32.vlgmr.msra.gmra.mrb[0].mxu1 %v402_v40 }
 0x194   : > { %1756 = vmatpush3.bf16.msra.mxu1 %v2414_v7  ;;  %1539 = vmatprep.mubr.msk.f32.mxu1 %vm2163_vm0, %v2164_v9 }
 0x195   : > { %1757 = vmatprep.subr.bf16.mxu1 %v2162_v6 }
 0x198   : > { %1759 = vmatpush3.bf16.msra.mxu1 %v2422_v10 }
 0x199   : > { %1760 = vmatprep.subr.bf16.mxu1 %v2162_v6 }
 0x19c   : > { %1762 = vmatpush3.bf16.msra.mxu1 %v2428_v13 }
 0x19d   : > { %1763 = vmatprep.subr.bf16.mxu1 %v2162_v6 }
 0x1a0   : > { %1765 = vmatpush3.bf16.msra.mxu1 %v2434_v16 }
 0x1a1   : > { %1766 = vmatprep.subr.bf16.mxu1 %v2162_v6 }
 0x1a4   : > { %1768 = vmatpush3.bf16.msra.mxu1 %v2440_v19 }
 0x1a5   : > { %1769 = vmatprep.subr.bf16.mxu1 %v2162_v6 }
 0x1a8   : > { %1771 = vmatpush3.bf16.msra.mxu1 %v2446_v22 }
 0x1a9   : > { %1772 = vmatprep.subr.bf16.mxu1 %v2162_v6 }
 0x1ac   : > { %1774 = vmatpush3.bf16.msra.mxu1 %v2452_v25 }
 0x1ad   : > { %1775 = vmatprep.subr.bf16.mxu1 %v2162_v6 }
 0x1b0   : > { %1777 = vmatpush3.bf16.msra.mxu1 %v2458_v28 }
 0x1b1   : > { %1802 = vmatprep.subr.bf16.mxu1 %v2162_v6 }
 0x266   : > { %v489_v42 = vpop.f32.mrb[0].mxu1 }
 0x267   : > { %v490_v44 = vadd.f32 %v1237_v41, %v489_v42  ;;  %v1471_v45 = vpop.f32.mrb[1].mxu1 }
 0x269   : > { %v493_v46 = vadd.f32 %v490_v44, %v420_v43  ;;  %v1256_v44 = vld [vmem:[%s2397_s5 + $0x38] sm:$0xff] }
 0x26b   : > { %1963 = vtanh.f32 %v493_v46  ;;  %v517_v53 = vmul.f32 0.9, %v493_v46 }
 0x275   : > { %v1964_v47 = vpop.eup %1963 }
 0x276   : > { %v495_v49 = vmax.f32 %v1964_v47, 0.0 }
 0x278   : > { %v498_v50 = vadd.f32 %v1238_v48, %v495_v49 }
 0x27a   : > { %1239 = vst [vmem:[%s2407_s9 + $0x8] sm:$0xff] %v498_v50  ;;  %1505 = vmatmul.mubr.f32.vlgmr.msra.gmra.mrb[2].mxu0 %v498_v50 }
 0x27b   : > { %1780 = vmatpush3.bf16.msra.mxu0 %v2414_v7  ;;  %1574 = vmatprep.mubr.msk.f32.mxu0 %vm2163_vm0, %v2164_v9 }
 0x27c   : > { %1781 = vmatprep.subr.bf16.mxu0 %v2162_v6 }
 0x27f   : > { %1783 = vmatpush3.bf16.msra.mxu0 %v2422_v10 }
 0x280   : > { %1784 = vmatprep.subr.bf16.mxu0 %v2162_v6 }
 0x283   : > { %1786 = vmatpush3.bf16.msra.mxu0 %v2428_v13 }
 0x284   : > { %1787 = vmatprep.subr.bf16.mxu0 %v2162_v6 }
 0x287   : > { %1789 = vmatpush3.bf16.msra.mxu0 %v2434_v16 }
 0x288   : > { %1790 = vmatprep.subr.bf16.mxu0 %v2162_v6 }
 0x28b   : > { %1792 = vmatpush3.bf16.msra.mxu0 %v2440_v19 }
 0x28c   : > { %1793 = vmatprep.subr.bf16.mxu0 %v2162_v6 }
 0x28f   : > { %1795 = vmatpush3.bf16.msra.mxu0 %v2446_v22 }
 0x290   : > { %1796 = vmatprep.subr.bf16.mxu0 %v2162_v6 }
 0x293   : > { %1798 = vmatpush3.bf16.msra.mxu0 %v2452_v25 }
 0x294   : > { %1799 = vmatprep.subr.bf16.mxu0 %v2162_v6 }
 0x297   : > { %1801 = vmatpush3.bf16.msra.mxu0 %v2458_v28 }
 0x298   : > { %1826 = vmatprep.subr.bf16.mxu0 %v2162_v6 }
 0x34d   : > { %v586_v52 = vpop.f32.mrb[2].mxu0 }
 0x34e   : > { %v587_v54 = vadd.f32 %v1240_v51, %v586_v52  ;;  %v1506_v55 = vpop.f32.mrb[3].mxu0 }
 0x350   : > { %v590_v56 = vadd.f32 %v587_v54, %v517_v53 }
 0x352   : > { %1965 = vtanh.f32 %v590_v56  ;;  %v614_v63 = vmul.f32 0.9, %v590_v56 }
 0x35c   : > { %v1966_v57 = vpop.eup %1965 }
 0x35d   : > { %v592_v59 = vmax.f32 %v1966_v57, 0.0 }
 0x35f   : > { %v595_v60 = vadd.f32 %v1241_v58, %v592_v59 }
 0x361   : > { %1242 = vst [vmem:[%s2407_s9 + $0x10] sm:$0xff] %v595_v60  ;;  %1540 = vmatmul.mubr.f32.vlgmr.msra.gmra.mrb[2].mxu1 %v595_v60 }
 0x362   : > { %1804 = vmatpush3.bf16.msra.mxu1 %v2414_v7  ;;  %1609 = vmatprep.mubr.msk.f32.mxu1 %vm2163_vm0, %v2164_v9 }
 0x363   : > { %1805 = vmatprep.subr.bf16.mxu1 %v2162_v6 }
 0x366   : > { %1807 = vmatpush3.bf16.msra.mxu1 %v2422_v10 }
 0x367   : > { %1808 = vmatprep.subr.bf16.mxu1 %v2162_v6 }
 0x36a   : > { %1810 = vmatpush3.bf16.msra.mxu1 %v2428_v13 }
 0x36b   : > { %1811 = vmatprep.subr.bf16.mxu1 %v2162_v6 }
 0x36e   : > { %1813 = vmatpush3.bf16.msra.mxu1 %v2434_v16 }
 0x36f   : > { %1814 = vmatprep.subr.bf16.mxu1 %v2162_v6 }
 0x372   : > { %1816 = vmatpush3.bf16.msra.mxu1 %v2440_v19 }
 0x373   : > { %1817 = vmatprep.subr.bf16.mxu1 %v2162_v6 }
 0x376   : > { %1819 = vmatpush3.bf16.msra.mxu1 %v2446_v22 }
 0x377   : > { %1820 = vmatprep.subr.bf16.mxu1 %v2162_v6 }
 0x37a   : > { %1822 = vmatpush3.bf16.msra.mxu1 %v2452_v25 }
 0x37b   : > { %1823 = vmatprep.subr.bf16.mxu1 %v2162_v6 }
 0x37e   : > { %1825 = vmatpush3.bf16.msra.mxu1 %v2458_v28 }
 0x37f   : > { %1850 = vmatprep.subr.bf16.mxu1 %v2162_v6 }
 0x434   : > { %v683_v62 = vpop.f32.mrb[2].mxu1 }
 0x435   : > { %v684_v0 = vadd.f32 %v1243_v61, %v683_v62  ;;  %v1541_v1 = vpop.f32.mrb[3].mxu1 }
 0x437   : > { %v687_v2 = vadd.f32 %v684_v0, %v614_v63 }
 0x439   : > { %1967 = vtanh.f32 %v687_v2  ;;  %v711_v14 = vmul.f32 0.9, %v687_v2 }
 0x443   : > { %v1968_v3 = vpop.eup %1967 }
 0x444   : > { %v689_v5 = vmax.f32 %v1968_v3, 0.0 }
 0x446   : > { %v692_v8 = vadd.f32 %v1244_v4, %v689_v5 }
 0x448   : > { %1245 = vst [vmem:[%s2407_s9 + $0x18] sm:$0xff] %v692_v8  ;;  %1575 = vmatmul.mubr.f32.vlgmr.msra.gmra.mrb[4].mxu0 %v692_v8 }
 0x449   : > { %1828 = vmatpush3.bf16.msra.mxu0 %v2414_v7  ;;  %1644 = vmatprep.mubr.msk.f32.mxu0 %vm2163_vm0, %v2164_v9 }
 0x44a   : > { %1829 = vmatprep.subr.bf16.mxu0 %v2162_v6 }
 0x44d   : > { %1831 = vmatpush3.bf16.msra.mxu0 %v2422_v10 }
 0x44e   : > { %1832 = vmatprep.subr.bf16.mxu0 %v2162_v6 }
 0x451   : > { %1834 = vmatpush3.bf16.msra.mxu0 %v2428_v13 }
 0x452   : > { %1835 = vmatprep.subr.bf16.mxu0 %v2162_v6 }
 0x455   : > { %1837 = vmatpush3.bf16.msra.mxu0 %v2434_v16 }
 0x456   : > { %1838 = vmatprep.subr.bf16.mxu0 %v2162_v6 }
 0x459   : > { %1840 = vmatpush3.bf16.msra.mxu0 %v2440_v19 }
 0x45a   : > { %1841 = vmatprep.subr.bf16.mxu0 %v2162_v6 }
 0x45d   : > { %1843 = vmatpush3.bf16.msra.mxu0 %v2446_v22 }
 0x45e   : > { %1844 = vmatprep.subr.bf16.mxu0 %v2162_v6 }
 0x461   : > { %1846 = vmatpush3.bf16.msra.mxu0 %v2452_v25 }
 0x462   : > { %1847 = vmatprep.subr.bf16.mxu0 %v2162_v6 }
 0x465   : > { %1849 = vmatpush3.bf16.msra.mxu0 %v2458_v28 }
 0x51b   : > { %v780_v12 = vpop.f32.mrb[4].mxu0 }
 0x51c   : > { %v781_v15 = vadd.f32 %v1246_v11, %v780_v12  ;;  %v1576_v17 = vpop.f32.mrb[5].mxu0 }
 0x51e   : > { %v784_v18 = vadd.f32 %v781_v15, %v711_v14 }
 0x520   : > { %1969 = vtanh.f32 %v784_v18 }
 0x52a   : > { %v1970_v20 = vpop.eup %1969 }
 0x52b   : > { %v786_v23 = vmax.f32 %v1970_v20, 0.0 }
 0x52d   : > { %v789_v24 = vadd.f32 %v1247_v21, %v786_v23 }
 0x52f   : > { %1248 = vst [vmem:[%s2407_s9 + $0x20] sm:$0xff] %v789_v24  ;;  %1610 = vmatmul.mubr.f32.vlgmr.msra.gmra.mrb[4].mxu1 %v789_v24 }
 0x530   : > { %1852 = vmatpush3.bf16.msra.mxu1 %v2414_v7  ;;  %1679 = vmatprep.mubr.msk.f32.mxu1 %vm2163_vm0, %v2164_v9  ;;  %v1249_v7 = vld [vmem:[%s2390_s29 + $0x28] sm:$0xff] }
 0x531   : > { %1853 = vmatprep.subr.bf16.mxu1 %v2162_v6 }
 0x534   : > { %1855 = vmatpush3.bf16.msra.mxu1 %v2422_v10  ;;  %v808_v10 = vmul.f32 0.9, %v784_v18 }
 0x535   : > { %1856 = vmatprep.subr.bf16.mxu1 %v2162_v6 }
 0x538   : > { %1858 = vmatpush3.bf16.msra.mxu1 %v2428_v13 }
 0x539   : > { %1859 = vmatprep.subr.bf16.mxu1 %v2162_v6 }
 0x53c   : > { %1861 = vmatpush3.bf16.msra.mxu1 %v2434_v16 }
 0x53d   : > { %1862 = vmatprep.subr.bf16.mxu1 %v2162_v6 }
 0x540   : > { %1864 = vmatpush3.bf16.msra.mxu1 %v2440_v19 }
 0x541   : > { %1865 = vmatprep.subr.bf16.mxu1 %v2162_v6 }
 0x544   : > { %1867 = vmatpush3.bf16.msra.mxu1 %v2446_v22  ;;  %v1250_v22 = vld [vmem:[%s2397_s5 + $0x28] sm:$0xff] }
 0x545   : > { %1868 = vmatprep.subr.bf16.mxu1 %v2162_v6 }
 0x548   : > { %1870 = vmatpush3.bf16.msra.mxu1 %v2452_v25  ;;  %v1252_v25 = vld [vmem:[%s2390_s29 + $0x30] sm:$0xff] }
 0x549   : > { %1871 = vmatprep.subr.bf16.mxu1 %v2162_v6 }
 0x54c   : > { %1873 = vmatpush3.bf16.msra.mxu1 %v2458_v28 }
 0x602   : > { %v877_v9 = vpop.f32.mrb[4].mxu1 }
 0x603   : > { %v878_v13 = vadd.f32 %v1249_v7, %v877_v9  ;;  %v1611_v16 = vpop.f32.mrb[5].mxu1 }
 0x605   : > { %v881_v19 = vadd.f32 %v878_v13, %v808_v10 }
 0x607   : > { %1971 = vtanh.f32 %v881_v19  ;;  %v905_v30 = vmul.f32 0.9, %v881_v19 }
 0x611   : > { %v1972_v26 = vpop.eup %1971 }
 0x612   : > { %v883_v27 = vmax.f32 %v1972_v26, 0.0 }
 0x614   : > { %v886_v29 = vadd.f32 %v1250_v22, %v883_v27 }
 0x616   : > { %1251 = vst [vmem:[%s2407_s9 + $0x28] sm:$0xff] %v886_v29  ;;  %1645 = vmatmul.mubr.f32.vlgmr.msra.gmra.mrb[6].mxu0 %v886_v29 }
 0x6e9   : > { %v974_v6 = vpop.f32.mrb[6].mxu0 }
 0x6ea   : > { %v975_v28 = vadd.f32 %v1252_v25, %v974_v6  ;;  %v1646_v31 = vpop.f32.mrb[7].mxu0 }
 0x6ec   : > { %v978_v32 = vadd.f32 %v975_v28, %v905_v30 }
 0x6ee   : > { %1973 = vtanh.f32 %v978_v32  ;;  %v1002_v39 = vmul.f32 0.9, %v978_v32 }
 0x6f8   : > { %v1974_v33 = vpop.eup %1973 }
 0x6f9   : > { %v980_v35 = vmax.f32 %v1974_v33, 0.0 }
 0x6fb   : > { %v983_v36 = vadd.f32 %v1253_v34, %v980_v35 }
 0x6fd   : > { %1254 = vst [vmem:[%s2407_s9 + $0x30] sm:$0xff] %v983_v36  ;;  %1680 = vmatmul.mubr.f32.vlgmr.msra.gmra.mrb[6].mxu1 %v983_v36 }
 0x7d0   : > { %v1071_v38 = vpop.f32.mrb[6].mxu1 }
 0x7d1   : > { %v1072_v40 = vadd.f32 %v1255_v37, %v1071_v38  ;;  %v1681_v41 = vpop.f32.mrb[7].mxu1 }
 0x7d3   : > { %v1075_v42 = vadd.f32 %v1072_v40, %v1002_v39 }
 0x7d5   : > { %1975 = vtanh.f32 %v1075_v42  ;;  %1083 = vst [vmem:[#allocation2] sm:$0xff] %v1075_v42 }
 0x7df   : > { %v1976_v43 = vpop.eup %1975 }
 0x7e0   : > { %v1077_v45 = vmax.f32 %v1976_v43, 0.0 }
 0x7e2   : > { %v1080_v46 = vadd.f32 %v1256_v44, %v1077_v45 }
 0x7e4   : > { %1257 = vst [vmem:[%s2407_s9 + $0x38] sm:$0xff] %v1080_v46  ;;  %1084 = vst [vmem:[#allocation3] sm:$0xff] %v1080_v46 }
 0x7e5   : > { %2078 = shalt.err (!%p2075_p12)
}
 0x7e6   : > { %s2079_s8 = scalar_lea.hbm %s2601_s10, 1024  ;;  %s2083_s13 = scalar_lea.hbm %s2656_s4, 3072 }
 0x7e7   : > { %p2080_p10 = scmp.ne.s32.totalorder %s2601_s10, %s2079_s8  ;;  %p2084_p13 = scmp.lt.u32.totalorder %s2601_s10, %s2656_s4 }
 0x7e8   : > { %p2085_p0 = scmp.lt.u32.totalorder %s2083_s13, %s2079_s8  ;;  %p2087_p9 = scmp.lt.u32.totalorder %s2079_s8, %s2601_s10 }
 0x7e9   : > { %p2081_p3 = pnand %p2080_p10, %p2287_p11 }
 0x7ea   : > { %p2086_p5 = por %p2085_p0, %p2084_p13 }
 0x7eb   : > { %p2082_p6 = pneg %p2081_p3 }
 0x7ec   : > { %p2088_p1 = por %p2087_p9, %p2086_p5 }
 0x7ee   : > { %p2089_p2 = pnand %p2088_p1, %p2082_p6 }
 0x7f0   : > { %2092 = shalt.err (!%p2089_p2)
}
 0x7f1   : > { %s2166_s9 = smov 128   ;;  %s2167_s14 = smov 8  }
 0x7f2   : > { %1882 = dma.vmem_to_hbm [thread:$0]  (%p2287_p11), %s2603_s23, 1024, %s2601_s10, %s1086_s2, %s2166_s9, %s2166_s9, %s2167_s14  }
 0x7f3 PF: > { %p1902_p7 = scmp.ge.s32.totalorder %s2155_s20, 2  ;;  %s1115_s30 = sand.u32 1, %s2135_s15  }
 0x7f4   : > { %p2684_p4 = scmp.ne.s32.totalorder %s2668_s24, 0  ;;  %s1116_s21 = scalar_lea.sflag [#allocation6], %s1115_s30 }
 0x7f6   : > { %p1896_p8 = pnand %p1902_p7, %p2684_p4 }
 0x7f8   : > { %2130 = dma.done.wait (!%p1896_p8), %s1116_s21, 1024  }
 0x7f9   : > { %2132 = vsyncadd (!%p1896_p8), %s1116_s21, 4294966272  ;;  %s23_s20 = sadd.s32 1, %s2155_s20   ;;  %s2685_s28 = sld [smem:[#allocation15_spill]] }
 0x7fa   : > { %p20_p12 = scmp.ge.s32.totalorder %s23_s20, 5   ;;  %s2686_s15 = smov %s2139_s16 }
 0x7fb   : > { %s2687_s16 = smov %s2143_s17  ;;  %s2688_s17 = smov %s2296_s7 }
 0x7fc   : > { %s2689_s18 = smov %s2151_s19  ;;  %22 = sbr.rel (!%p20_p12) target bundleno = 11 (0xb), region = 123 }
 0x7ff   : > { %s2690_s19 = smov %s2685_s28 }
 0x803   :  { %1121 = vsyncpa [#allocation5], 1 }
 0x804   :  { %1123 = vsyncpa [#allocation5 + $0x1], 1 }
 0x805   :  { %1124 = vsyncpa [#allocation8], 1 }
 0x806   :  { %1126 = vsyncpa [#allocation8 + $0x1], 1 }
 0x807   :  { %1127 = vsyncpa [#allocation6], 1 }
 0x808   :  { %1129 = vsyncpa [#allocation6 + $0x1], 1 }

</bundles_post_ra>
